<compile_context>
chip_gen: v5e
topology: v5e:2x2
jax: 0.10.0
libtpu: 0.0.40
codegen_flags: <defaults>
</compile_context>

<pallas_src>
import jax
import jax.numpy as jnp
from jax.experimental import pallas as pl
from jax.experimental.pallas import tpu as pltpu


def _identity_kernel(x_ref, o_ref):
    # Pure pass-through: copy the current VMEM tile to the output tile.
    o_ref[...] = x_ref[...]


# Lane-dense slab width: 8 * 128 lanes -> wide unmasked vector loads/stores.
_LANE = 1024
# ~4 MiB per block: large enough to reach HBM roofline, small enough that
# 2 (in) + 2 (out) double-buffers (16 MiB) fit every generation's VMEM,
# including v7x's 64 MiB physical / 32 MiB scoped budget.
_TARGET_BLOCK_BYTES = 4 * 1024 * 1024
_VMEM_LIMIT_BYTES = 32 * 1024 * 1024


def identity_forward(x):
    """Identity forward pass: returns an array equal to `x` (same shape, dtype)."""
    orig_shape = x.shape
    orig_dtype = x.dtype
    total = x.size
    if total == 0:
        return x

    itemsize = jnp.dtype(orig_dtype).itemsize

    # Rows of _LANE elements each (ceil).
    rows_needed = pl.cdiv(total, _LANE)

    # Row tile sized for ~_TARGET_BLOCK_BYTES, rounded down to a multiple of 8
    # so the (8, 128) tiling constraint is satisfied with unmasked tiles.
    tr = max(8, (_TARGET_BLOCK_BYTES // (_LANE * itemsize)) // 8 * 8)

    if rows_needed <= tr:
        # Small input: one block covering the whole (padded) array.  A block
        # equal to the full array shape has no (8, 128) divisibility constraint.
        tr = rows_needed
        rows = rows_needed
    else:
        # Pad rows up to a multiple of the tile so every block is full and
        # unmasked and the grid divides evenly (>= 2 steps -> both v7x
        # TensorCores issue DMAs under dimension_semantics=("parallel",)).
        rows = pl.cdiv(rows_needed, tr) * tr

    padded_total = rows * _LANE
    x_flat = x.reshape(-1)
    if padded_total != total:
        x_flat = jnp.pad(x_flat, (0, padded_total - total))
    x2d = x_flat.reshape(rows, _LANE)

    grid = (rows // tr,)

    out2d = pl.pallas_call(
        _identity_kernel,
        out_shape=jax.ShapeDtypeStruct((rows, _LANE), orig_dtype),
        grid_spec=pltpu.PrefetchScalarGridSpec(
            num_scalar_prefetch=0,
            grid=grid,
            in_specs=[pl.BlockSpec((tr, _LANE), lambda i: (i, 0))],
            out_specs=pl.BlockSpec((tr, _LANE), lambda i: (i, 0)),
        ),
        compiler_params=pltpu.CompilerParams(
            dimension_semantics=("parallel",),
            vmem_limit_bytes=_VMEM_LIMIT_BYTES,
        ),
        # Let XLA alias the output to the input buffer (donate when possible)
        # instead of allocating + writing a second full-size HBM array.
        input_output_aliases={0: 0},
    )(x2d)

    out_flat = out2d.reshape(-1)
    if padded_total != total:
        out_flat = out_flat[:total]
    return out_flat.reshape(orig_shape)


class IdentityPallas:
    """Mirror of the PyTorch Identity module: stores in_features, forward is a no-op copy."""

    def __init__(self, n_inputs):
        self.in_features = n_inputs  # no parameters to initialize

    def __call__(self, x):
        return identity_forward(x)


if __name__ == "__main__":
    key = jax.random.PRNGKey(0)
    # Small NCHW input consistent with a conv-backbone feature map.
    x = jax.random.normal(key, (2, 4, 16, 16), dtype=jnp.float32)

    model = IdentityPallas(n_inputs=4 * 16 * 16)
    y = model(x)
    y = jax.block_until_ready(y)

    assert y.shape == x.shape and y.dtype == x.dtype
    assert bool(jnp.array_equal(y, x))
    print("KERNEL_OK")
</pallas_src>

<mosaic_0001>
module attributes {stable_mosaic.version = 11 : i64} {
  func.func @_identity_kernel(%arg0: i32, %arg1: memref<2x1024xf32, #tpu.memory_space<vmem>>, %arg2: memref<2x1024xf32, #tpu.memory_space<vmem>>) attributes {dimension_semantics = [#tpu.dimension_semantics<parallel>], iteration_bounds = array<i64: 1>, scalar_prefetch = 0 : i64, scratch_operands = 0 : i64, tpu.core_type = #tpu.core_type<tc>, window_params = [{transform_indices = @transform_0, window_bounds = array<i64: 2, 1024>}, {transform_indices = @transform_1, window_bounds = array<i64: 2, 1024>}]} {
    %c0 = arith.constant 0 : index
    %c0_0 = arith.constant 0 : index
    %0 = vector.load %arg1[%c0, %c0_0] : memref<2x1024xf32, #tpu.memory_space<vmem>>, vector<2x1024xf32>
    %c0_1 = arith.constant 0 : index
    %c0_2 = arith.constant 0 : index
    %1 = vector.load %arg2[%c0_1, %c0_2] : memref<2x1024xf32, #tpu.memory_space<vmem>>, vector<2x1024xf32>
    tpu.vector_store %arg2[%c0_1, %c0_2], %0 {strides = array<i32>} : memref<2x1024xf32, #tpu.memory_space<vmem>>, vector<2x1024xf32>,
    return
  }
  func.func @transform_0(%arg0: i32) -> (i32, i32) {
    %c0_i32 = arith.constant 0 : i32
    %c0_i32_0 = arith.constant 0 : i32
    return %arg0, %c0_i32 : i32, i32
  }
  func.func @transform_1(%arg0: i32) -> (i32, i32) {
    %c0_i32 = arith.constant 0 : i32
    %c0_i32_0 = arith.constant 0 : i32
    return %arg0, %c0_i32 : i32, i32
  }
}

</mosaic_0001>

<bundles_post_ra>
// kernel: tpu_custom_call.1
= control target key start
LH: loop header
LB: loop body
LE: loop exit
PB: predicated region body
PF: predicated region fallthrough
CT: control target
= control target key end

     0   :  { %6 = vsyncpa [#allocation3], 0  ;;  %s116_s0 = inlined_call_operand.hbm [shape: f32[2,1024], index: 0, kind: input, shape index: {}, may-alias: {0,1}]   ;;  %s117_s1 = inlined_call_operand.hbm [shape: f32[2,1024], index: 1, kind: output, shape index: {}, may-alias: {0,1}]  }
   0x1   :  { %7 = vsyncpa [#allocation4], 0  ;;  %s13_s8 = sshll.u32 %s116_s0, 4  ;;  %s98_s9 = smov [#allocation2]   ;;  %s14_s8 = int_to_ptr.hbm [resolvable:$true] %s13_s8 }
   0x2   :  { %s15_s10 = sshll.u32 %s98_s9, 4  ;;  %s16_s10 = int_to_ptr.vmem [resolvable:$true] %s15_s10 }
   0x3   :  { %18 = dma.hbm_to_vmem [thread:$0]  %s14_s8, 256, %s16_s10, [#allocation3]  }
   0x4   :  { %94 = dma.done.wait [#allocation3], 256  }
   0x5   :  { %95 = vsyncadd [#allocation3], 4294967040  ;;  %s99_s11 = smov [#allocation5]   ;;  %s34_s15 = sshll.u32 %s117_s1, 4  ;;  %v23_v0 = vld [vmem:[#allocation2] sm:$0xff]  ;;  %v24_v1 = vld [vmem:[#allocation2 + $0x8] sm:$0xff]  ;;  %s35_s15 = int_to_ptr.hbm [resolvable:$true] %s34_s15 }
   0x6   :  { %s32_s12 = sshll.u32 %s99_s11, 4  ;;  %25 = vst [vmem:[#allocation5] sm:$0xff] %v23_v0  ;;  %s33_s12 = int_to_ptr.vmem [resolvable:$true] %s32_s12 }
   0x7   :  { %26 = vst [vmem:[#allocation5 + $0x8] sm:$0xff] %v24_v1 }
   0x8   :  { %37 = dma.vmem_to_hbm [thread:$0]  %s33_s12, 256, %s35_s15, [#allocation4]  }
   0x9   :  { %96 = dma.done.wait [#allocation4], 256  }
   0xa   :  { %97 = vsyncadd [#allocation4], 4294967040 }
   0xb   :  { %42 = vsyncpa [#allocation3], 1 }
   0xc   :  { %43 = vsyncpa [#allocation4], 1 }

</bundles_post_ra>
